<compile_context>
chip_gen: v7x
topology: tpu7x:2x2x1
jax: 0.10.0
libtpu: 0.0.40
codegen_flags: <defaults>
</compile_context>

<pallas_src>
import jax
import jax.numpy as jnp
from jax.experimental import pallas as pl
from jax.experimental.pallas import tpu as pltpu

H, W = 3, 3          # state_shape fixed by the module
P = H * W            # 9 spatial positions
NEG_SLOPE = 0.01     # F.leaky_relu default negative_slope
MAX_TM = 2048        # batch tile (rows); ~3-4 MiB double-buffered in VMEM
ROW_ALIGN = 16       # sublane alignment for bf16 row tiles


def _round_up(x, m):
    return ((x + m - 1) // m) * m


def _pick_tile(B):
    """Largest tile <= MAX_TM; for B > MAX_TM pick tm so the grid is even."""
    if B <= MAX_TM:
        return min(MAX_TM, _round_up(max(B, 1), ROW_ALIGN))
    k = 1
    while _round_up(-(-B // (2 * k)), ROW_ALIGN) > MAX_TM:
        k += 1
    return _round_up(-(-B // (2 * k)), ROW_ALIGN)


def network_kernel(x_ref, wc_ref, bc_ref, wf_ref, bf_ref, o_ref):
    # 1x1 conv as one bf16 matmul (f32 accumulate) against the block-diagonal
    # weight, bias fused.
    h = jnp.dot(x_ref[...], wc_ref[...],
                preferred_element_type=jnp.float32) + bc_ref[...]
    h = jnp.where(h >= 0, h, NEG_SLOPE * h)              # leaky_relu (f32)
    # Fully-connected layer: bf16 matmul, f32 accumulate, bias fused.
    o_ref[...] = jnp.dot(h.astype(jnp.bfloat16), wf_ref[...],
                         preferred_element_type=jnp.float32) + bf_ref[...]


def network_forward(x_nchw, w_conv, b_conv, w_fc, b_fc):
    """x_nchw: (B, n_actions+1, 3, 3) float32, exactly like the PyTorch module."""
    B, C_in, h, w = x_nchw.shape
    assert (h, w) == (H, W)
    C_out = w_conv.shape[0]          # n_actions
    A = w_fc.shape[0]                # n_actions
    K1 = C_in * P                    # conv-input flat width  (e.g. 45)
    K2 = C_out * P                   # conv-output flat width (e.g. 36)
    A_OUT = _round_up(max(A, 8), 8)  # narrow, masked-store-friendly out width

    # ---- parameter re-layout (plain-JAX glue, tiny) -------------------------
    # Block-diagonal conv weight: Wbig[c*9+p, o*9+p] = w_conv[o, c]
    wc = jnp.kron(jnp.transpose(w_conv.reshape(C_out, C_in)),
                  jnp.eye(P, dtype=jnp.float32)).astype(jnp.bfloat16)  # (K1,K2)
    bc = jnp.repeat(b_conv, P).reshape(1, K2).astype(jnp.float32)      # (1,K2)

    # FC weight: flat order already matches torch .view -> transpose, pad the
    # output (lane) axis only to A_OUT (8), not 128.
    wf = (jnp.zeros((K2, A_OUT), jnp.float32)
          .at[:, :A].set(jnp.transpose(w_fc))).astype(jnp.bfloat16)
    bf = jnp.zeros((1, A_OUT), jnp.float32).at[0, :A].set(b_fc)

    # ---- activation layout: free reshape of NCHW -> (B, C_in*9), cast bf16 --
    x_mat = x_nchw.reshape(B, K1).astype(jnp.bfloat16)

    tm = _pick_tile(B)
    num_tiles = pl.cdiv(B, tm)       # ragged last block handled by Pallas

    cost = pl.CostEstimate(
        flops=2 * B * (K1 * K2 + K2 * A_OUT),
        transcendentals=0,
        bytes_accessed=B * (K1 * 2 + A_OUT * 4)
                       + K1 * K2 * 2 + K2 * 4 + K2 * A_OUT * 2 + A_OUT * 4,
    )

    out = pl.pallas_call(
        network_kernel,
        out_shape=jax.ShapeDtypeStruct((B, A_OUT), jnp.float32),
        grid=(num_tiles,),
        in_specs=[
            pl.BlockSpec((tm, K1), lambda i: (i, 0)),     # x tile (pipelined)
            pl.BlockSpec((K1, K2), lambda i: (0, 0)),     # conv weight (resident)
            pl.BlockSpec((1, K2), lambda i: (0, 0)),      # conv bias
            pl.BlockSpec((K2, A_OUT), lambda i: (0, 0)),  # fc weight
            pl.BlockSpec((1, A_OUT), lambda i: (0, 0)),   # fc bias
        ],
        out_specs=pl.BlockSpec((tm, A_OUT), lambda i: (i, 0)),
        compiler_params=pltpu.CompilerParams(
            dimension_semantics=("parallel",)),
        cost_estimate=cost,
    )(x_mat, wc, bc, wf, bf)

    return out[:, :A]


def reference_forward(x_nchw, w_conv, b_conv, w_fc, b_fc):
    """Pure-JAX f32 reproduction of the PyTorch forward (for verification)."""
    B = x_nchw.shape[0]
    C_out = w_conv.shape[0]
    y = jnp.einsum('bihw,oi->bohw', x_nchw, w_conv.reshape(C_out, -1))
    y = y + b_conv.reshape(1, C_out, 1, 1)
    y = jnp.where(y >= 0, y, NEG_SLOPE * y)
    flat = y.reshape(B, C_out * P)                       # torch .view order
    return flat @ w_fc.T + b_fc


if __name__ == "__main__":
    n_actions = 4
    C_in = n_actions + 1
    B = 2

    key = jax.random.PRNGKey(0)
    k_x, k_wc, k_bc, k_wf, k_bf = jax.random.split(key, 5)

    # Deterministic synthetic parameters (shapes from the module __init__).
    x = jax.random.normal(k_x, (B, C_in, H, W), dtype=jnp.float32)
    w_conv = 0.1 * jax.random.normal(k_wc, (n_actions, C_in, 1, 1), dtype=jnp.float32)
    b_conv = 0.1 * jax.random.normal(k_bc, (n_actions,), dtype=jnp.float32)
    w_fc = 0.1 * jax.random.normal(k_wf, (n_actions, P * n_actions), dtype=jnp.float32)
    b_fc = 0.1 * jax.random.normal(k_bf, (n_actions,), dtype=jnp.float32)

    out = jax.block_until_ready(network_forward(x, w_conv, b_conv, w_fc, b_fc))
    ref = reference_forward(x, w_conv, b_conv, w_fc, b_fc)
    assert out.shape == (B, n_actions)
    # bf16 inputs / f32 accumulate -> slightly looser tolerance than pure f32.
    assert jnp.allclose(out, ref, atol=2e-2, rtol=2e-2), (out, ref)

    # Larger, non-multiple-of-tile batch exercises the ragged last block.
    B2 = 1037
    x2 = jax.random.normal(jax.random.PRNGKey(1), (B2, C_in, H, W), dtype=jnp.float32)
    out2 = jax.block_until_ready(network_forward(x2, w_conv, b_conv, w_fc, b_fc))
    ref2 = reference_forward(x2, w_conv, b_conv, w_fc, b_fc)
    assert out2.shape == (B2, n_actions)
    assert jnp.allclose(out2, ref2, atol=2e-2, rtol=2e-2)

    # Batch large enough to force a multi-tile (even-length) grid.
    B3 = 4100
    x3 = jax.random.normal(jax.random.PRNGKey(2), (B3, C_in, H, W), dtype=jnp.float32)
    out3 = jax.block_until_ready(network_forward(x3, w_conv, b_conv, w_fc, b_fc))
    ref3 = reference_forward(x3, w_conv, b_conv, w_fc, b_fc)
    assert out3.shape == (B3, n_actions)
    assert jnp.allclose(out3, ref3, atol=2e-2, rtol=2e-2)

    print("KERNEL_OK")
</pallas_src>

<mosaic_0001>
module attributes {stable_mosaic.version = 11 : i64} {
  func.func @network_kernel(%arg0: i32, %arg1: memref<16x45xbf16, #tpu.memory_space<vmem>>, %arg2: memref<45x36xbf16, #tpu.memory_space<vmem>>, %arg3: memref<1x36xf32, #tpu.memory_space<vmem>>, %arg4: memref<36x8xbf16, #tpu.memory_space<vmem>>, %arg5: memref<1x8xf32, #tpu.memory_space<vmem>>, %arg6: memref<16x8xf32, #tpu.memory_space<vmem>>) attributes {dimension_semantics = [#tpu.dimension_semantics<parallel>], iteration_bounds = array<i64: 1>, scalar_prefetch = 0 : i64, scratch_operands = 0 : i64, tpu.core_type = #tpu.core_type<tc>, window_params = [{transform_indices = @transform_0, window_bounds = array<i64: 16, 45>}, {pipeline_mode = #tpu.pipeline_mode<synchronous>, transform_indices = @transform_1, window_bounds = array<i64: 45, 36>}, {pipeline_mode = #tpu.pipeline_mode<synchronous>, transform_indices = @transform_2, window_bounds = array<i64: 1, 36>}, {pipeline_mode = #tpu.pipeline_mode<synchronous>, transform_indices = @transform_3, window_bounds = array<i64: 36, 8>}, {pipeline_mode = #tpu.pipeline_mode<synchronous>, transform_indices = @transform_4, window_bounds = array<i64: 1, 8>}, {transform_indices = @transform_5, window_bounds = array<i64: 16, 8>}]} {
    %c0 = arith.constant 0 : index
    %c0_0 = arith.constant 0 : index
    %0 = vector.load %arg1[%c0, %c0_0] : memref<16x45xbf16, #tpu.memory_space<vmem>>, vector<16x45xbf16>
    %c0_1 = arith.constant 0 : index
    %c0_2 = arith.constant 0 : index
    %1 = vector.load %arg2[%c0_1, %c0_2] : memref<45x36xbf16, #tpu.memory_space<vmem>>, vector<45x36xbf16>
    %cst = arith.constant dense<0.000000e+00> : vector<16x36xf32>
    %2 = tpu.matmul %0, %1, %cst {dimension_numbers = #tpu.dot_dimension_numbers<[1], [0], [0], [1], [0, 0, 1, 1], [], []>} : vector<16x45xbf16>, vector<45x36xbf16>, vector<16x36xf32> -> vector<16x36xf32>
    %c0_3 = arith.constant 0 : index
    %c0_4 = arith.constant 0 : index
    %3 = vector.load %arg3[%c0_3, %c0_4] : memref<1x36xf32, #tpu.memory_space<vmem>>, vector<1x36xf32>
    %4 = vector.broadcast %3 : vector<1x36xf32> to vector<16x36xf32>
    %5 = arith.addf %2, %4 : vector<16x36xf32>
    %cst_5 = arith.constant 0.000000e+00 : f32
    %6 = vector.broadcast %cst_5 : f32 to vector<16x36xf32>
    %7 = arith.cmpf oge, %5, %6 : vector<16x36xf32>
    %cst_6 = arith.constant 0.00999999977 : f32
    %8 = vector.broadcast %cst_6 : f32 to vector<16x36xf32>
    %9 = arith.mulf %8, %5 : vector<16x36xf32>
    %10 = arith.select %7, %5, %9 : vector<16x36xi1>, vector<16x36xf32>
    %11 = arith.truncf %10 : vector<16x36xf32> to vector<16x36xbf16>
    %c0_7 = arith.constant 0 : index
    %c0_8 = arith.constant 0 : index
    %12 = vector.load %arg4[%c0_7, %c0_8] : memref<36x8xbf16, #tpu.memory_space<vmem>>, vector<36x8xbf16>
    %cst_9 = arith.constant dense<0.000000e+00> : vector<16x8xf32>
    %13 = tpu.matmul %11, %12, %cst_9 {dimension_numbers = #tpu.dot_dimension_numbers<[1], [0], [0], [1], [0, 0, 1, 1], [], []>} : vector<16x36xbf16>, vector<36x8xbf16>, vector<16x8xf32> -> vector<16x8xf32>
    %c0_10 = arith.constant 0 : index
    %c0_11 = arith.constant 0 : index
    %14 = vector.load %arg5[%c0_10, %c0_11] : memref<1x8xf32, #tpu.memory_space<vmem>>, vector<1x8xf32>
    %15 = vector.broadcast %14 : vector<1x8xf32> to vector<16x8xf32>
    %16 = arith.addf %13, %15 : vector<16x8xf32>
    %c0_12 = arith.constant 0 : index
    %c0_13 = arith.constant 0 : index
    %17 = vector.load %arg6[%c0_12, %c0_13] : memref<16x8xf32, #tpu.memory_space<vmem>>, vector<16x8xf32>
    tpu.vector_store %arg6[%c0_12, %c0_13], %16 {strides = array<i32>} : memref<16x8xf32, #tpu.memory_space<vmem>>, vector<16x8xf32>,
    return
  }
  func.func @transform_0(%arg0: i32) -> (i32, i32) {
    %c0_i32 = arith.constant 0 : i32
    %c0_i32_0 = arith.constant 0 : i32
    return %arg0, %c0_i32 : i32, i32
  }
  func.func @transform_1(%arg0: i32) -> (i32, i32) {
    %c0_i32 = arith.constant 0 : i32
    %c0_i32_0 = arith.constant 0 : i32
    %c0_i32_1 = arith.constant 0 : i32
    return %c0_i32, %c0_i32_0 : i32, i32
  }
  func.func @transform_2(%arg0: i32) -> (i32, i32) {
    %c0_i32 = arith.constant 0 : i32
    %c0_i32_0 = arith.constant 0 : i32
    %c0_i32_1 = arith.constant 0 : i32
    return %c0_i32, %c0_i32_0 : i32, i32
  }
  func.func @transform_3(%arg0: i32) -> (i32, i32) {
    %c0_i32 = arith.constant 0 : i32
    %c0_i32_0 = arith.constant 0 : i32
    %c0_i32_1 = arith.constant 0 : i32
    return %c0_i32, %c0_i32_0 : i32, i32
  }
  func.func @transform_4(%arg0: i32) -> (i32, i32) {
    %c0_i32 = arith.constant 0 : i32
    %c0_i32_0 = arith.constant 0 : i32
    %c0_i32_1 = arith.constant 0 : i32
    return %c0_i32, %c0_i32_0 : i32, i32
  }
  func.func @transform_5(%arg0: i32) -> (i32, i32) {
    %c0_i32 = arith.constant 0 : i32
    %c0_i32_0 = arith.constant 0 : i32
    return %arg0, %c0_i32 : i32, i32
  }
}

</mosaic_0001>

<bundles_post_ra>
// kernel: tpu_custom_call.1
= control target key start
LH: loop header
LB: loop body
LE: loop exit
PB: predicated region body
PF: predicated region fallthrough
CT: control target
= control target key end

     0   :  { %10 = vsyncpa [#allocation3], 0  ;;  %v346_v1 = vmov 0.0   ;;  %vm121_vm0 = vcmask 1045504   ;;  %vm122_vm1 = vcmask 1046528   ;;  %v347_v4 = vmov 65535   ;;  %s443_s0 = inlined_call_operand.vmem [shape: bf16[2,45], index: 0, kind: input, shape index: {}]   ;;  %s444_s1 = inlined_call_operand.vmem [shape: bf16[45,36], index: 1, kind: input, shape index: {}]   ;;  %s445_s2 = inlined_call_operand.vmem [shape: f32[1,36], index: 2, kind: input, shape index: {}]   ;;  %s446_s3 = inlined_call_operand.vmem [shape: bf16[36,8], index: 3, kind: input, shape index: {}]   ;;  %s447_s4 = inlined_call_operand.vmem [shape: f32[1,8], index: 4, kind: input, shape index: {}]   ;;  %s448_s5 = inlined_call_operand.hbm [shape: f32[2,8], index: 5, kind: output, shape index: {}]  }
   0x1   :  { %v316_v0 = vld [vmem:[%s444_s1] sm:$0xff]   ;;  %289 = vmatprep.subr.bf16.mxu0 %v346_v1  ;;  %299 = vmatprep.subr.bf16.mxu1 %v346_v1  ;;  %v317_v2 = vld [vmem:[%s444_s1 + $0x8] sm:$0xff]   ;;  %v318_v3 = vld [vmem:[%s444_s1 + $0x10] sm:$0x7f]   ;;  %v123_v5 = vsel %vm121_vm0, 4294967295, %v347_v4  ;;  %vm348_vm2 = vmmov 0   ;;  %v58_v8 = vlaneseq }
   0x2   :  { %290 = vmatpush3.bf16.msra.mxu0 %v316_v0  ;;  %295 = vmatprep.mubr.msk.bf16.mxu0 %vm348_vm2, %v346_v1  ;;  %v22_v6 = vld [vmem:[%s443_s0] sm:$0x1]  ;;  %v23_v7 = vld [vmem:[%s443_s0 + $0x1] sm:$0x1]  ;;  %v124_v9 = vsel %vm122_vm1, %v123_v5, 0  ;;  %vm117_vm3 = vcmask 367616  }
   0x3   :  { %291 = vmatprep.subr.bf16.mxu0 %v346_v1  ;;  %305 = vmatprep.mubr.msk.bf16.mxu1 %vm348_vm2, %v346_v1  ;;  %v24_v10 = vld [vmem:[%s443_s0 + $0x2] sm:$0x1]  ;;  %v25_v11 = vld [vmem:[%s443_s0 + $0x3] sm:$0x1]  ;;  %v126_v13 = vand.u32 %v318_v3, %v124_v9  ;;  %v26_v14 = vld [vmem:[%s443_s0 + $0x4] sm:$0x1]  ;;  %v51_v21 = vcombine.low %v22_v6, %v23_v7 }
   0x4   :  { %v319_v12 = vld [vmem:[%s446_s3] sm:$0xff]   ;;  %v349_v18 = vmov 1966171168   ;;  %v59_v20 = vshrl.u32 %v58_v8, 7  ;;  %v52_v22 = vcombine.low %v24_v10, %v25_v11  ;;  %v320_v36 = vld [vmem:[%s446_s3 + $0x8] sm:$0xff]   ;;  %vm207_vm4 = vcmask 1041408  }
   0x5   :  { %v27_v15 = vld [vmem:[%s443_s0 + $0x5] sm:$0x1]  ;;  %v28_v16 = vld [vmem:[%s443_s0 + $0x6] sm:$0x1]  ;;  %v29_v17 = vld [vmem:[%s443_s0 + $0x7] sm:$0x1]  ;;  %300 = vmatpush3.bf16.msra.mxu1 %v319_v12  ;;  %v56_v19 = vunpack.c.l.s4 %v349_v18 }
   0x6   :  { %292 = vmatpush3.bf16.msra.mxu0 %v317_v2  ;;  %301 = vmatprep.subr.bf16.mxu1 %v346_v1  ;;  %v53_v23 = vcombine.low %v26_v14, %v27_v15  ;;  %v54_v24 = vcombine.low %v28_v16, %v29_v17  ;;  %v321_v37 = vld [vmem:[%s446_s3 + $0x10] ss:$0 sps:$4 sm:$0x33]   ;;  %v271_v39 = vld [vmem:[%s445_s2] ss:$0 sm:$0xff]  ;;  %vm203_vm7 = vcmask 293888  }
   0x7   :  { %293 = vmatprep.subr.bf16.mxu0 %v346_v1  ;;  %v57_v25 = vunpack.c.0.s8 %v56_v19  ;;  %v209_v38 = vsel %vm207_vm4, %v321_v37, 0  ;;  %v276_v51 = vld [vmem:[%s447_s4] ss:$0 sm:$0xff]  ;;  %vm252_vm8 = vcmask 64512  }
   0x9   :  { %v60_v26 = vsub.s32 %v57_v25, %v59_v20  ;;  %302 = vmatpush3.bf16.msra.mxu1 %v320_v36 }
   0xa   :  { %294 = vmatpush3.bf16.msra.mxu0 %v126_v13  ;;  %303 = vmatprep.subr.bf16.mxu1 %v346_v1 }
   0xb   :  { %v61_v27 = vrot.slane %v51_v21, %v60_v26  ;;  %v68_v28 = vrot.slane %v52_v22, %v60_v26  ;;  %v75_v29 = vrot.slane %v53_v23, %v60_v26  ;;  %v82_v30 = vrot.slane %v54_v24, %v60_v26 }
   0xd   :  { %v83_v31 = vcombine.low %v61_v27, %v68_v28  ;;  %v84_v32 = vcombine.low %v75_v29, %v82_v30  ;;  %304 = vmatpush3.bf16.msra.mxu1 %v209_v38 }
   0xf   :  { %v91_v33 = vrot.slane %v83_v31, %v60_v26  ;;  %v98_v34 = vrot.slane %v84_v32, %v60_v26 }
  0x11   :  { %v99_v35 = vcombine.low %v91_v33, %v98_v34 }
  0x13   :  { %296 = vmatmul.mubr.msk.bf16.vlgmr.msra.gmra.mrb[0].mxu0 %vm117_vm3, %v99_v35 }
  0xe6   :  { %v162_v40 = vpop.f32.mrb[0].mxu0 }
  0xe7   :  { %v163_v41 = vadd.f32 %v271_v39, %v162_v40  ;;  %v297_v42 = vpop.f32.mrb[1].mxu0 }
  0xe8   :  { %v165_v43 = vpop.f32.mrb[2].mxu0 }
  0xe9   :  { %v171_v44 = vmul.f32 0.01, %v163_v41  ;;  %v166_v45 = vadd.f32 %v271_v39, %v165_v43  ;;  %v298_v46 = vpop.f32.mrb[3].mxu0  ;;  %vm169_vm5 = vcmp.ge.f32.partialorder %v163_v41, 0.0 }
  0xeb   :  { %vm170_vm6 = vcmp.ge.f32.partialorder %v166_v45, 0.0  ;;  %v172_v47 = vmul.f32 0.01, %v166_v45  ;;  %v173_v48 = vsel %vm169_vm5, %v163_v41, %v171_v44 }
  0xed   :  { %v174_v49 = vsel %vm170_vm6, %v166_v45, %v172_v47 }
  0xee   :  { %v175_v50 = vpack.c.bf16 %v174_v49, %v173_v48 }
  0xf0   :  { %306 = vmatmul.mubr.msk.bf16.vlgmr.msra.gmra.mrb[0].mxu1 %vm203_vm7, %v175_v50 }
 0x1c3   :  { %v245_v52 = vpop.f32.mrb[0].mxu1 }
 0x1c4   :  { %v246_v53 = vadd.f32 %v276_v51, %v245_v52  ;;  %v307_v54 = vpop.f32.mrb[1].mxu1 }
 0x1c5   :  { %v248_v55 = vpop.f32.mrb[2].mxu1 }
 0x1c6   :  { %253 = vst.msk [vmem:[#allocation2] sm:$0xff] %vm252_vm8, %v246_v53  ;;  %v249_v56 = vadd.f32 %v276_v51, %v248_v55  ;;  %v308_v57 = vpop.f32.mrb[3].mxu1 }
 0x1c8   :  { %254 = vst.msk [vmem:[#allocation2 + $0x8] sm:$0xff] %vm252_vm8, %v249_v56 }
 0x1c9   :  { %259 = vsyncadd [#allocation3], 224  ;;  %s350_s2 = smov [#allocation2]  }
 0x1ca   :  { %s260_s22 = sshll.u32 %s350_s2, 4  ;;  %s261_s22 = int_to_ptr.vmem [resolvable:$true] %s260_s22 }
 0x1cb   :  { %s322_s23 = scalar_lea.vmem %s261_s22, 32  ;;  %s326_s24 = scalar_lea.vmem %s261_s22, 256 }
 0x1cc   :  { %p323_p0 = scmp.ne.s32.totalorder %s261_s22, %s322_s23  ;;  %p327_p1 = scmp.lt.s32.totalorder %s261_s22, %s261_s22 }
 0x1cd   :  { %p328_p2 = scmp.lt.s32.totalorder %s326_s24, %s322_s23 }
 0x1cf   :  { %p329_p3 = por %p328_p2, %p327_p1 }
 0x1d1   :  { %p330_p4 = pnand %p329_p3, %p323_p0 }
 0x1d3   :  { %333 = shalt.err (!%p330_p4)
}
 0x1d4   :  { %s334_s26 = scalar_lea.hbm %s448_s5, 32 }
 0x1d5   :  { %p335_p5 = scmp.ne.s32.totalorder %s448_s5, %s334_s26  ;;  %p338_p6 = scmp.lt.u32.totalorder %s334_s26, %s448_s5 }
 0x1d7   :  { %p340_p7 = pnand %p338_p6, %p335_p5 }
 0x1d9   :  { %343 = shalt.err (!%p340_p7)
}
 0x1da   :  { %s351_s30 = smov 32   ;;  %s352_s6 = smov 2  }
 0x1db   :  { %266 = dma.vmem_to_hbm [thread:$0]  %s261_s22, 32, %s448_s5, [#allocation3], %s351_s30, %s351_s30, %s352_s6  }
 0x1dc   :  { %344 = dma.done.wait [#allocation3], 256  }
 0x1dd   :  { %345 = vsyncadd [#allocation3], 4294967040 }
 0x1de   :  { %270 = vsyncpa [#allocation3], 1 }

</bundles_post_ra>
